<compile_context>
chip_gen: v6e
topology: v6e:2x2x1
jax: 0.10.0
libtpu: 0.0.40
codegen_flags: <defaults>
</compile_context>

<pallas_src>
import jax
import jax.numpy as jnp
from jax import lax
from jax.experimental import pallas as pl
from jax.experimental.pallas import tpu as pltpu


def _make_kernel(H, W, Cin, hidden, oup, use_res_connect):
    HW = H * W
    small_cin = Cin <= 8  # K=Cin matmul is degenerate on the MXU -> use VPU MACs

    def kernel(x_ref, w1t_ref, b1_ref, wtap_ref, b2_ref, w2t_ref, b3_ref, o_ref):
        x = x_ref[0]                                       # (Cin, HW) lane-dense

        # ---- 1x1 expand conv (+bias, ReLU6) -> (hidden, HW) ----
        if small_cin:
            w1t = w1t_ref[...]                             # (hidden, Cin), BN folded
            h = w1t[:, 0:1] * x[0:1, :]
            for c in range(1, Cin):
                h = h + w1t[:, c:c + 1] * x[c:c + 1, :]
        else:
            h = jnp.dot(w1t_ref[...], x, preferred_element_type=jnp.float32)
        h = jnp.clip(h + b1_ref[...], 0.0, 6.0)

        # ---- 3x3 depthwise conv: XLU lane rolls + pre-masked weight planes ----
        acc = jnp.zeros((hidden, HW), jnp.float32)
        for t in range(9):
            dh, dw = t // 3 - 1, t % 3 - 1
            s = dh * W + dw                                # flat lane offset of tap
            # tap[i] = h[(i + s) % HW]; out-of-image / wrapped lanes are zeroed
            # because the boundary mask is folded into wtap in the wrapper.
            tap = h if s == 0 else pltpu.roll(h, (-s) % HW, axis=1)
            acc = acc + tap * wtap_ref[t]                  # (hidden, HW) plane
        d = jnp.clip(acc + b2_ref[...], 0.0, 6.0)

        # ---- 1x1 project conv (+bias) -> (oup, HW), + residual ----
        out = jnp.dot(w2t_ref[...], d, preferred_element_type=jnp.float32)
        out = out + b3_ref[...]
        if use_res_connect:
            out = out + x
        o_ref[0] = out.astype(o_ref.dtype)

    return kernel


def inverted_residual_pallas(x_nchw, params, *, use_res_connect):
    """params: w1 (Cin,hid), s1/b1 (1,hid), wdw (3,3,hid) HWC, s2/b2 (1,hid),
    w2 (hid,oup), s3/b3 (1,oup)  (PyTorch weight layouts pre-transposed)."""
    B, Cin, H, W = x_nchw.shape
    hidden = params["w1"].shape[1]
    oup = params["w2"].shape[1]
    HW = H * W
    f32 = jnp.float32

    x_flat = x_nchw.reshape(B, Cin, HW).astype(f32)        # free reshape only

    # Fold eval-mode BN scales into the conv weights (one-time precompute).
    w1t = (params["w1"] * params["s1"]).T.astype(f32)      # (hidden, Cin)
    b1c = params["b1"].T.astype(f32)                       # (hidden, 1)
    b2c = params["b2"].T.astype(f32)                       # (hidden, 1)
    w2t = (params["w2"] * params["s3"]).T.astype(f32)      # (oup, hidden)
    b3c = params["b3"].T.astype(f32)                       # (oup, 1)

    # Per-tap depthwise weight planes with the 3x3 boundary mask folded in:
    #   wtap[t, j, l] = wdw[dh+1, dw+1, j] * s2[j] * mask_{dh,dw}(l)
    lane = jnp.arange(HW, dtype=jnp.int32)
    hp, wp = lane // W, lane % W
    wdw_f = (params["wdw"] * params["s2"][0]).astype(f32)  # (3, 3, hidden)
    planes = []
    for dh in (-1, 0, 1):
        for dw in (-1, 0, 1):
            valid = ((hp + dh >= 0) & (hp + dh < H) &
                     (wp + dw >= 0) & (wp + dw < W)).astype(f32)     # (HW,)
            planes.append(wdw_f[dh + 1, dw + 1][:, None] * valid[None, :])
    wtap = jnp.stack(planes, axis=0)                       # (9, hidden, HW)

    kernel = _make_kernel(H, W, Cin, hidden, oup, use_res_connect)

    const2 = lambda b: (0, 0)
    const3 = lambda b: (0, 0, 0)
    grid_spec = pltpu.PrefetchScalarGridSpec(
        num_scalar_prefetch=0,
        grid=(B,),
        in_specs=[
            pl.BlockSpec((1, Cin, HW), lambda b: (b, 0, 0)),   # x (per-batch block)
            pl.BlockSpec((hidden, Cin), const2),               # w1t (resident)
            pl.BlockSpec((hidden, 1), const2),                 # b1
            pl.BlockSpec((9, hidden, HW), const3),             # wtap (mask-folded)
            pl.BlockSpec((hidden, 1), const2),                 # b2
            pl.BlockSpec((oup, hidden), const2),               # w2t
            pl.BlockSpec((oup, 1), const2),                    # b3
        ],
        out_specs=pl.BlockSpec((1, oup, HW), lambda b: (b, 0, 0)),
    )

    out_flat = pl.pallas_call(
        kernel,
        out_shape=jax.ShapeDtypeStruct((B, oup, HW), f32),
        grid_spec=grid_spec,
        compiler_params=pltpu.CompilerParams(
            dimension_semantics=("parallel",)),                # v7x: 2 TCs
    )(x_flat, w1t, b1c, wtap, b2c, w2t, b3c)

    return out_flat.reshape(B, oup, H, W)                      # free reshape to NCHW


def _fold_bn(gamma, beta, mean, var, eps=1e-5):
    scale = gamma / jnp.sqrt(var + eps)
    bias = beta - mean * scale
    return scale[None, :], bias[None, :]


def _reference_nhwc(x_nhwc, p, use_res_connect):
    hidden = p["w1"].shape[1]
    h = jnp.einsum("bhwc,ck->bhwk", x_nhwc, p["w1"])
    h = jnp.clip(h * p["s1"][0] + p["b1"][0], 0.0, 6.0)
    d = lax.conv_general_dilated(
        h, p["wdw"][:, :, None, :], window_strides=(1, 1),
        padding=((1, 1), (1, 1)),
        dimension_numbers=("NHWC", "HWIO", "NHWC"),
        feature_group_count=hidden)
    d = jnp.clip(d * p["s2"][0] + p["b2"][0], 0.0, 6.0)
    o = jnp.einsum("bhwk,ko->bhwo", d, p["w2"]) * p["s3"][0] + p["b3"][0]
    if use_res_connect:
        o = o + x_nhwc
    return o


if __name__ == "__main__":
    # Module config: inp=4, oup=4, stride=1, expand_ratio=6, kernel=3
    inp, oup, stride, expand_ratio = 4, 4, 1, 6
    hidden = round(inp * expand_ratio)          # 24
    use_res_connect = (stride == 1 and inp == oup)

    B, H, W = 2, 16, 16
    key = jax.random.PRNGKey(0)
    ks = jax.random.split(key, 12)

    # Deterministic synthetic parameters (PyTorch layouts noted in comments).
    w1 = 0.2 * jax.random.normal(ks[0], (inp, hidden), jnp.float32)      # (hid,inp,1,1)^T
    wdw = 0.2 * jax.random.normal(ks[1], (3, 3, hidden), jnp.float32)    # (hid,1,3,3) -> HWC
    w2 = 0.2 * jax.random.normal(ks[2], (hidden, oup), jnp.float32)      # (oup,hid,1,1)^T

    def bn_params(k, c):
        k1, k2, k3, k4 = jax.random.split(k, 4)
        gamma = 1.0 + 0.1 * jax.random.normal(k1, (c,), jnp.float32)
        beta = 0.1 * jax.random.normal(k2, (c,), jnp.float32)
        mean = 0.1 * jax.random.normal(k3, (c,), jnp.float32)
        var = jnp.abs(jax.random.normal(k4, (c,), jnp.float32)) + 0.5
        return _fold_bn(gamma, beta, mean, var)

    s1, b1 = bn_params(ks[3], hidden)
    s2, b2 = bn_params(ks[4], hidden)
    s3, b3 = bn_params(ks[5], oup)

    params = dict(w1=w1, s1=s1, b1=b1, wdw=wdw, s2=s2, b2=b2,
                  w2=w2, s3=s3, b3=b3)

    x = jax.random.normal(ks[6], (B, inp, H, W), jnp.float32)   # NCHW like PyTorch

    out = inverted_residual_pallas(x, params, use_res_connect=use_res_connect)
    out = jax.block_until_ready(out)

    # Independent pure-JAX reference (unfolded BN params / NHWC conv).
    ref = _reference_nhwc(jnp.transpose(x, (0, 2, 3, 1)), params, use_res_connect)
    ref = jnp.transpose(ref, (0, 3, 1, 2))
    assert out.shape == (B, oup, H, W)
    assert bool(jnp.allclose(out, ref, rtol=1e-4, atol=1e-4)), "mismatch vs reference"

    print("KERNEL_OK")
</pallas_src>

<mosaic_0001>
module attributes {stable_mosaic.version = 11 : i64} {
  func.func @kernel(%arg0: i32, %arg1: memref<1x4x256xf32, #tpu.memory_space<vmem>>, %arg2: memref<24x4xf32, #tpu.memory_space<vmem>>, %arg3: memref<24x1xf32, #tpu.memory_space<vmem>>, %arg4: memref<9x24x256xf32, #tpu.memory_space<vmem>>, %arg5: memref<24x1xf32, #tpu.memory_space<vmem>>, %arg6: memref<4x24xf32, #tpu.memory_space<vmem>>, %arg7: memref<4x1xf32, #tpu.memory_space<vmem>>, %arg8: memref<1x4x256xf32, #tpu.memory_space<vmem>>) attributes {dimension_semantics = [#tpu.dimension_semantics<parallel>], iteration_bounds = array<i64: 2>, scalar_prefetch = 0 : i64, scratch_operands = 0 : i64, tpu.core_type = #tpu.core_type<tc>, window_params = [{transform_indices = @transform_0, window_bounds = array<i64: 1, 4, 256>}, {pipeline_mode = #tpu.pipeline_mode<synchronous>, transform_indices = @transform_1, window_bounds = array<i64: 24, 4>}, {pipeline_mode = #tpu.pipeline_mode<synchronous>, transform_indices = @transform_2, window_bounds = array<i64: 24, 1>}, {pipeline_mode = #tpu.pipeline_mode<synchronous>, transform_indices = @transform_3, window_bounds = array<i64: 9, 24, 256>}, {pipeline_mode = #tpu.pipeline_mode<synchronous>, transform_indices = @transform_4, window_bounds = array<i64: 24, 1>}, {pipeline_mode = #tpu.pipeline_mode<synchronous>, transform_indices = @transform_5, window_bounds = array<i64: 4, 24>}, {pipeline_mode = #tpu.pipeline_mode<synchronous>, transform_indices = @transform_6, window_bounds = array<i64: 4, 1>}, {transform_indices = @transform_7, window_bounds = array<i64: 1, 4, 256>}]} {
    %c0 = arith.constant 0 : index
    %c0_0 = arith.constant 0 : index
    %c0_1 = arith.constant 0 : index
    %0 = vector.load %arg1[%c0, %c0_0, %c0_1] : memref<1x4x256xf32, #tpu.memory_space<vmem>>, vector<1x4x256xf32>
    %1 = vector.shape_cast %0 : vector<1x4x256xf32> to vector<4x256xf32>
    %c0_2 = arith.constant 0 : index
    %c0_3 = arith.constant 0 : index
    %2 = vector.load %arg2[%c0_2, %c0_3] : memref<24x4xf32, #tpu.memory_space<vmem>>, vector<24x4xf32>
    %3 = vector.extract_strided_slice %2 {offsets = [0, 0], sizes = [24, 1], strides = [1, 1]} : vector<24x4xf32> to vector<24x1xf32>
    %4 = vector.extract_strided_slice %1 {offsets = [0, 0], sizes = [1, 256], strides = [1, 1]} : vector<4x256xf32> to vector<1x256xf32>
    %5 = vector.broadcast %3 : vector<24x1xf32> to vector<24x256xf32>
    %6 = vector.broadcast %4 : vector<1x256xf32> to vector<24x256xf32>
    %7 = arith.mulf %5, %6 : vector<24x256xf32>
    %8 = vector.extract_strided_slice %2 {offsets = [0, 1], sizes = [24, 1], strides = [1, 1]} : vector<24x4xf32> to vector<24x1xf32>
    %9 = vector.extract_strided_slice %1 {offsets = [1, 0], sizes = [1, 256], strides = [1, 1]} : vector<4x256xf32> to vector<1x256xf32>
    %10 = vector.broadcast %8 : vector<24x1xf32> to vector<24x256xf32>
    %11 = vector.broadcast %9 : vector<1x256xf32> to vector<24x256xf32>
    %12 = arith.mulf %10, %11 : vector<24x256xf32>
    %13 = arith.addf %7, %12 : vector<24x256xf32>
    %14 = vector.extract_strided_slice %2 {offsets = [0, 2], sizes = [24, 1], strides = [1, 1]} : vector<24x4xf32> to vector<24x1xf32>
    %15 = vector.extract_strided_slice %1 {offsets = [2, 0], sizes = [1, 256], strides = [1, 1]} : vector<4x256xf32> to vector<1x256xf32>
    %16 = vector.broadcast %14 : vector<24x1xf32> to vector<24x256xf32>
    %17 = vector.broadcast %15 : vector<1x256xf32> to vector<24x256xf32>
    %18 = arith.mulf %16, %17 : vector<24x256xf32>
    %19 = arith.addf %13, %18 : vector<24x256xf32>
    %20 = vector.extract_strided_slice %2 {offsets = [0, 3], sizes = [24, 1], strides = [1, 1]} : vector<24x4xf32> to vector<24x1xf32>
    %21 = vector.extract_strided_slice %1 {offsets = [3, 0], sizes = [1, 256], strides = [1, 1]} : vector<4x256xf32> to vector<1x256xf32>
    %22 = vector.broadcast %20 : vector<24x1xf32> to vector<24x256xf32>
    %23 = vector.broadcast %21 : vector<1x256xf32> to vector<24x256xf32>
    %24 = arith.mulf %22, %23 : vector<24x256xf32>
    %25 = arith.addf %19, %24 : vector<24x256xf32>
    %c0_4 = arith.constant 0 : index
    %c0_5 = arith.constant 0 : index
    %26 = vector.load %arg3[%c0_4, %c0_5] : memref<24x1xf32, #tpu.memory_space<vmem>>, vector<24x1xf32>
    %27 = vector.broadcast %26 : vector<24x1xf32> to vector<24x256xf32>
    %28 = arith.addf %25, %27 : vector<24x256xf32>
    %cst = arith.constant 0.000000e+00 : f32
    %cst_6 = arith.constant 6.000000e+00 : f32
    %29 = vector.broadcast %cst : f32 to vector<24x256xf32>
    %30 = arith.maximumf %29, %28 : vector<24x256xf32>
    %31 = vector.broadcast %cst_6 : f32 to vector<24x256xf32>
    %32 = arith.minimumf %31, %30 : vector<24x256xf32>
    %cst_7 = arith.constant 0.000000e+00 : f32
    %33 = vector.broadcast %cst_7 : f32 to vector<24x256xf32>
    %c17_i32 = arith.constant 17 : i32
    %34 = tpu.dynamic_rotate %32 by %c17_i32 dim 1 : vector<24x256xf32>, i32 -> vector<24x256xf32>
    %c0_8 = arith.constant 0 : index
    %c0_9 = arith.constant 0 : index
    %c0_10 = arith.constant 0 : index
    %35 = vector.load %arg4[%c0_8, %c0_9, %c0_10] : memref<9x24x256xf32, #tpu.memory_space<vmem>>, vector<1x24x256xf32>
    %36 = vector.shape_cast %35 : vector<1x24x256xf32> to vector<24x256xf32>
    %37 = arith.mulf %34, %36 : vector<24x256xf32>
    %38 = arith.addf %33, %37 : vector<24x256xf32>
    %c16_i32 = arith.constant 16 : i32
    %39 = tpu.dynamic_rotate %32 by %c16_i32 dim 1 : vector<24x256xf32>, i32 -> vector<24x256xf32>
    %c1 = arith.constant 1 : index
    %c0_11 = arith.constant 0 : index
    %c0_12 = arith.constant 0 : index
    %40 = vector.load %arg4[%c1, %c0_11, %c0_12] : memref<9x24x256xf32, #tpu.memory_space<vmem>>, vector<1x24x256xf32>
    %41 = vector.shape_cast %40 : vector<1x24x256xf32> to vector<24x256xf32>
    %42 = arith.mulf %39, %41 : vector<24x256xf32>
    %43 = arith.addf %38, %42 : vector<24x256xf32>
    %c15_i32 = arith.constant 15 : i32
    %44 = tpu.dynamic_rotate %32 by %c15_i32 dim 1 : vector<24x256xf32>, i32 -> vector<24x256xf32>
    %c2 = arith.constant 2 : index
    %c0_13 = arith.constant 0 : index
    %c0_14 = arith.constant 0 : index
    %45 = vector.load %arg4[%c2, %c0_13, %c0_14] : memref<9x24x256xf32, #tpu.memory_space<vmem>>, vector<1x24x256xf32>
    %46 = vector.shape_cast %45 : vector<1x24x256xf32> to vector<24x256xf32>
    %47 = arith.mulf %44, %46 : vector<24x256xf32>
    %48 = arith.addf %43, %47 : vector<24x256xf32>
    %c1_i32 = arith.constant 1 : i32
    %49 = tpu.dynamic_rotate %32 by %c1_i32 dim 1 : vector<24x256xf32>, i32 -> vector<24x256xf32>
    %c3 = arith.constant 3 : index
    %c0_15 = arith.constant 0 : index
    %c0_16 = arith.constant 0 : index
    %50 = vector.load %arg4[%c3, %c0_15, %c0_16] : memref<9x24x256xf32, #tpu.memory_space<vmem>>, vector<1x24x256xf32>
    %51 = vector.shape_cast %50 : vector<1x24x256xf32> to vector<24x256xf32>
    %52 = arith.mulf %49, %51 : vector<24x256xf32>
    %53 = arith.addf %48, %52 : vector<24x256xf32>
    %c4 = arith.constant 4 : index
    %c0_17 = arith.constant 0 : index
    %c0_18 = arith.constant 0 : index
    %54 = vector.load %arg4[%c4, %c0_17, %c0_18] : memref<9x24x256xf32, #tpu.memory_space<vmem>>, vector<1x24x256xf32>
    %55 = vector.shape_cast %54 : vector<1x24x256xf32> to vector<24x256xf32>
    %56 = arith.mulf %32, %55 : vector<24x256xf32>
    %57 = arith.addf %53, %56 : vector<24x256xf32>
    %c255_i32 = arith.constant 255 : i32
    %58 = tpu.dynamic_rotate %32 by %c255_i32 dim 1 : vector<24x256xf32>, i32 -> vector<24x256xf32>
    %c5 = arith.constant 5 : index
    %c0_19 = arith.constant 0 : index
    %c0_20 = arith.constant 0 : index
    %59 = vector.load %arg4[%c5, %c0_19, %c0_20] : memref<9x24x256xf32, #tpu.memory_space<vmem>>, vector<1x24x256xf32>
    %60 = vector.shape_cast %59 : vector<1x24x256xf32> to vector<24x256xf32>
    %61 = arith.mulf %58, %60 : vector<24x256xf32>
    %62 = arith.addf %57, %61 : vector<24x256xf32>
    %c241_i32 = arith.constant 241 : i32
    %63 = tpu.dynamic_rotate %32 by %c241_i32 dim 1 : vector<24x256xf32>, i32 -> vector<24x256xf32>
    %c6 = arith.constant 6 : index
    %c0_21 = arith.constant 0 : index
    %c0_22 = arith.constant 0 : index
    %64 = vector.load %arg4[%c6, %c0_21, %c0_22] : memref<9x24x256xf32, #tpu.memory_space<vmem>>, vector<1x24x256xf32>
    %65 = vector.shape_cast %64 : vector<1x24x256xf32> to vector<24x256xf32>
    %66 = arith.mulf %63, %65 : vector<24x256xf32>
    %67 = arith.addf %62, %66 : vector<24x256xf32>
    %c240_i32 = arith.constant 240 : i32
    %68 = tpu.dynamic_rotate %32 by %c240_i32 dim 1 : vector<24x256xf32>, i32 -> vector<24x256xf32>
    %c7 = arith.constant 7 : index
    %c0_23 = arith.constant 0 : index
    %c0_24 = arith.constant 0 : index
    %69 = vector.load %arg4[%c7, %c0_23, %c0_24] : memref<9x24x256xf32, #tpu.memory_space<vmem>>, vector<1x24x256xf32>
    %70 = vector.shape_cast %69 : vector<1x24x256xf32> to vector<24x256xf32>
    %71 = arith.mulf %68, %70 : vector<24x256xf32>
    %72 = arith.addf %67, %71 : vector<24x256xf32>
    %c239_i32 = arith.constant 239 : i32
    %73 = tpu.dynamic_rotate %32 by %c239_i32 dim 1 : vector<24x256xf32>, i32 -> vector<24x256xf32>
    %c8 = arith.constant 8 : index
    %c0_25 = arith.constant 0 : index
    %c0_26 = arith.constant 0 : index
    %74 = vector.load %arg4[%c8, %c0_25, %c0_26] : memref<9x24x256xf32, #tpu.memory_space<vmem>>, vector<1x24x256xf32>
    %75 = vector.shape_cast %74 : vector<1x24x256xf32> to vector<24x256xf32>
    %76 = arith.mulf %73, %75 : vector<24x256xf32>
    %77 = arith.addf %72, %76 : vector<24x256xf32>
    %c0_27 = arith.constant 0 : index
    %c0_28 = arith.constant 0 : index
    %78 = vector.load %arg5[%c0_27, %c0_28] : memref<24x1xf32, #tpu.memory_space<vmem>>, vector<24x1xf32>
    %79 = vector.broadcast %78 : vector<24x1xf32> to vector<24x256xf32>
    %80 = arith.addf %77, %79 : vector<24x256xf32>
    %cst_29 = arith.constant 0.000000e+00 : f32
    %cst_30 = arith.constant 6.000000e+00 : f32
    %81 = vector.broadcast %cst_29 : f32 to vector<24x256xf32>
    %82 = arith.maximumf %81, %80 : vector<24x256xf32>
    %83 = vector.broadcast %cst_30 : f32 to vector<24x256xf32>
    %84 = arith.minimumf %83, %82 : vector<24x256xf32>
    %c0_31 = arith.constant 0 : index
    %c0_32 = arith.constant 0 : index
    %85 = vector.load %arg6[%c0_31, %c0_32] : memref<4x24xf32, #tpu.memory_space<vmem>>, vector<4x24xf32>
    %cst_33 = arith.constant dense<0.000000e+00> : vector<4x256xf32>
    %86 = tpu.matmul %85, %84, %cst_33 {dimension_numbers = #tpu.dot_dimension_numbers<[1], [0], [0], [1], [0, 0, 1, 1], [], []>} : vector<4x24xf32>, vector<24x256xf32>, vector<4x256xf32> -> vector<4x256xf32>
    %c0_34 = arith.constant 0 : index
    %c0_35 = arith.constant 0 : index
    %87 = vector.load %arg7[%c0_34, %c0_35] : memref<4x1xf32, #tpu.memory_space<vmem>>, vector<4x1xf32>
    %88 = vector.broadcast %87 : vector<4x1xf32> to vector<4x256xf32>
    %89 = arith.addf %86, %88 : vector<4x256xf32>
    %90 = arith.addf %89, %1 : vector<4x256xf32>
    %c0_36 = arith.constant 0 : index
    %c0_37 = arith.constant 0 : index
    %c0_38 = arith.constant 0 : index
    %91 = vector.load %arg8[%c0_36, %c0_37, %c0_38] : memref<1x4x256xf32, #tpu.memory_space<vmem>>, vector<1x4x256xf32>
    %92 = vector.shape_cast %91 : vector<1x4x256xf32> to vector<4x256xf32>
    %93 = vector.shape_cast %90 : vector<4x256xf32> to vector<1x4x256xf32>
    tpu.vector_store %arg8[%c0_36, %c0_37, %c0_38], %93 {strides = array<i32>} : memref<1x4x256xf32, #tpu.memory_space<vmem>>, vector<1x4x256xf32>,
    return
  }
  func.func @transform_0(%arg0: i32) -> (i32, i32, i32) {
    %c0_i32 = arith.constant 0 : i32
    %c0_i32_0 = arith.constant 0 : i32
    %c0_i32_1 = arith.constant 0 : i32
    return %arg0, %c0_i32, %c0_i32_0 : i32, i32, i32
  }
  func.func @transform_1(%arg0: i32) -> (i32, i32) {
    %c0_i32 = arith.constant 0 : i32
    %c0_i32_0 = arith.constant 0 : i32
    %c0_i32_1 = arith.constant 0 : i32
    return %c0_i32, %c0_i32_0 : i32, i32
  }
  func.func @transform_2(%arg0: i32) -> (i32, i32) {
    %c0_i32 = arith.constant 0 : i32
    %c0_i32_0 = arith.constant 0 : i32
    %c0_i32_1 = arith.constant 0 : i32
    return %c0_i32, %c0_i32_0 : i32, i32
  }
  func.func @transform_3(%arg0: i32) -> (i32, i32, i32) {
    %c0_i32 = arith.constant 0 : i32
    %c0_i32_0 = arith.constant 0 : i32
    %c0_i32_1 = arith.constant 0 : i32
    %c0_i32_2 = arith.constant 0 : i32
    return %c0_i32, %c0_i32_0, %c0_i32_1 : i32, i32, i32
  }
  func.func @transform_4(%arg0: i32) -> (i32, i32) {
    %c0_i32 = arith.constant 0 : i32
    %c0_i32_0 = arith.constant 0 : i32
    %c0_i32_1 = arith.constant 0 : i32
    return %c0_i32, %c0_i32_0 : i32, i32
  }
  func.func @transform_5(%arg0: i32) -> (i32, i32) {
    %c0_i32 = arith.constant 0 : i32
    %c0_i32_0 = arith.constant 0 : i32
    %c0_i32_1 = arith.constant 0 : i32
    return %c0_i32, %c0_i32_0 : i32, i32
  }
  func.func @transform_6(%arg0: i32) -> (i32, i32) {
    %c0_i32 = arith.constant 0 : i32
    %c0_i32_0 = arith.constant 0 : i32
    %c0_i32_1 = arith.constant 0 : i32
    return %c0_i32, %c0_i32_0 : i32, i32
  }
  func.func @transform_7(%arg0: i32) -> (i32, i32, i32) {
    %c0_i32 = arith.constant 0 : i32
    %c0_i32_0 = arith.constant 0 : i32
    %c0_i32_1 = arith.constant 0 : i32
    return %arg0, %c0_i32, %c0_i32_0 : i32, i32, i32
  }
}

</mosaic_0001>

<bundles_post_ra>
// kernel: tpu_custom_call.1
= control target key start
LH: loop header
LB: loop body
LE: loop exit
PB: predicated region body
PF: predicated region fallthrough
CT: control target
= control target key end

     0   :  { %12 = vsyncpa [#allocation3], 0  ;;  %s1739_s0 = inlined_call_operand.vmem [shape: f32[2,4,256], index: 0, kind: input, shape index: {}]   ;;  %s1740_s1 = inlined_call_operand.vmem [shape: f32[24,4], index: 1, kind: input, shape index: {}]   ;;  %s1741_s2 = inlined_call_operand.vmem [shape: f32[24,1], index: 2, kind: input, shape index: {}]   ;;  %s1742_s3 = inlined_call_operand.hbm [shape: f32[9,24,256], index: 3, kind: input, shape index: {}]   ;;  %s1743_s4 = inlined_call_operand.vmem [shape: f32[24,1], index: 4, kind: input, shape index: {}]   ;;  %s1744_s5 = inlined_call_operand.vmem [shape: f32[4,24], index: 5, kind: input, shape index: {}]   ;;  %s1745_s6 = inlined_call_operand.vmem [shape: f32[4,1], index: 6, kind: input, shape index: {}]   ;;  %s1746_s7 = inlined_call_operand.hbm [shape: f32[2,4,256], index: 7, kind: output, shape index: {}]  }
   0x1   :  { %13 = vsyncpa [#allocation4], 0 }
   0x2   :  { %15 = vsyncpa [#allocation4 + $0x1], 0  ;;  %s1277_s24 = smov 0   ;;  %s1279_s25 = smov 0  }
   0x3   :  { %s1281_s26 = smov 0   ;;  %s1283_s27 = smov 0  }
   0x4 LB: > { %s1298_s28 = sadd.s32 4294967295, %s1218_s27   ;;  %s1035_s29 = sadd.s32 4294967294, %s1218_s27   ;;  %s1218_s27 = sphi %s1283_s27, %s1764_s27   ;;  %s1214_s26 = sphi %s1281_s26, %s1763_s26   ;;  %s1210_s25 = sphi %s1279_s25, %s1762_s25   ;;  %s1206_s24 = sphi %s1277_s24, %s1761_s24  }
   0x5   : > { %s1302_s30 = sadd.s32 1, %s1218_s27   ;;  %s180_s8 = sadd.s32 1, %s1214_s26 }
   0x6   : > { %s177_s9 = ssub.s32 %s1218_s27, %s1302_s30  ;;  %p190_p0 = scmp.ne.s32.totalorder %s1214_s26, %s1210_s25 }
   0x7   : > { %p178_p1 = scmp.eq.s32.totalorder %s177_s9, 0  ;;  %p191_p2 = scmp.eq.s32.totalorder %s1298_s28, 1 }
   0x8   : > { %p196_p3 = scmp.ne.s32.totalorder %s1210_s25, %s1206_s24  ;;  %p197_p4 = scmp.eq.s32.totalorder %s1035_s29, 1 }
   0x9   : > { %s1313_s10 = scalar_select %p178_p1, %s1214_s26, %s180_s8  }
   0xa   : > { %p1315_p5 = por %p191_p2, %p190_p0  ;;  %p1319_p6 = por %p197_p4, %p196_p3 }
   0xb   : > { %p1036_p7 = scmp.ge.s32.totalorder %s1218_s27, 1  ;;  %p204_p8 = scmp.lt.s32.totalorder %s1218_s27, 3 }
   0xc   : > { %s1752_s12 = scalar_select %p1319_p6, 1, 0 }
   0xd   : > { %p1066_p9 = scmp.eq.s32.totalorder %s1298_s28, 0  ;;  %p1326_p10 = pnand %p1036_p7, %p204_p8 }
   0xe   : > { %s1220_s14 = smov [#allocation2]  }
   0xf   : > { %s222_s15 = sshll.u32 %s1220_s14, 4  ;;  %p1058_p11 = pneg %p1326_p10  ;;  %s223_s15 = int_to_ptr.vmem [resolvable:$true] %s222_s15 }
  0x10   : > { %s1139_s16 = scalar_lea.vmem %s223_s15, 6912  ;;  %p1147_p3 = scmp.lt.s32.totalorder %s223_s15, %s223_s15 }
  0x11   : > { %p1059_p12 = pnand %p1066_p9, %p1058_p11  ;;  %p1140_p0 = scmp.ne.s32.totalorder %s223_s15, %s1139_s16 }
  0x12   : > { %p1148_p4 = scmp.lt.s32.totalorder %s1139_s16, %s1139_s16 }
  0x13   : > { %p1130_p13 = pneg %p1059_p12 }
  0x14   : > { %p1149_p6 = por %p1148_p4, %p1147_p3 }
  0x15   : > { %p1142_p1 = pnand %p1140_p0, %p1130_p13 }
  0x17   : > { %p1143_p2 = pneg %p1142_p1 }
  0x19   : > { %p1150_p7 = pnand %p1149_p6, %p1143_p2 }
  0x1b   : > { %1153 = shalt.err (!%p1150_p7)
}
  0x1c   : > { %s1221_s17 = smov 256   ;;  %s1222_s18 = smov 16  }
  0x1d   : > { %1061 = dma.hbm_to_vmem [thread:$0]  (!%p1059_p12), %s1742_s3, 6912, %s223_s15, [#allocation3], %s1221_s17, %s1221_s17, %s1222_s18  }
  0x1e   : > { %255 = sbr.rel (%p1326_p10) target bundleno = 644 (0x284), region = 48 }
  0x23   : > { %1197 = dma.done.wait (%p1066_p9), [#allocation3], 6912  }
  0x24   : > { %1199 = vsyncadd (%p1066_p9), [#allocation3], 4294960384  ;;  %v1223_v0 = vmov 1   ;;  %v1224_v1 = vmov 0   ;;  %v295_v2 = vld [vmem:[%s1740_s1 + $0x10] sm:$0xff]  ;;  %v294_v3 = vld [vmem:[%s1740_s1 + $0x8] sm:$0xff]  ;;  %v312_v14 = vlaneseq }
  0x25   : > { %1117 = vset.pattern.permute.xlu0 %v1223_v0  ;;  %1118 = vset.pattern.permute.xlu1 %v1224_v1  ;;  %v1225_v4 = vmov 3   ;;  %v293_v5 = vld [vmem:[%s1740_s1] sm:$0xff]  ;;  %v1226_v6 = vmov 2   ;;  %v463_v7 = vld [vmem:[%s1741_s2 + $0x8] sm:$0xff]  ;;  %v464_v9 = vld [vmem:[%s1741_s2 + $0x10] sm:$0xff]  ;;  %p287_p6 = scmp.lt.s32.totalorder %s1298_s28, 1 }
  0x26   : > { %345 = vperm.xlu0 %1117, %v295_v2   ;;  %303 = vperm.xlu1 %1118, %v294_v3   ;;  %v823_v8 = vld [vmem:[%s1743_s4 + $0x8] sm:$0xff]  ;;  %v462_v10 = vld [vmem:[%s1741_s2] sm:$0xff]  ;;  %v824_v11 = vld [vmem:[%s1743_s4 + $0x10] sm:$0xff]  ;;  %v313_v17 = vshrl.u32 %v312_v14, 7  ;;  %s1227_s14 = smov 17   ;;  %s1228_s15 = smov 16  }
  0x27   : > { %s288_s23 = scalar_select %p287_p6, %s1298_s28, 1  ;;  %vm865_vm8 = vcmask 195584  }
  0x28   : > { %v314_v19 = vsub.s32 0, %v313_v17  ;;  %v318_v20 = vsub.s32 4, %v313_v17  ;;  %v350_v23 = vsub.s32 1, %v313_v17  ;;  %v354_v24 = vsub.s32 5, %v313_v17  ;;  %s1229_s16 = smov 15   ;;  %s1230_s17 = smov 1  }
  0x29   : > { %s1050_s29 = sshll.u32 %s288_s23, 3  ;;  %v392_v27 = vsub.s32 2, %v313_v17  ;;  %v396_v28 = vsub.s32 6, %v313_v17  ;;  %v434_v30 = vsub.s32 3, %v313_v17  ;;  %v438_v31 = vsub.s32 7, %v313_v17  ;;  %s1231_s18 = smov 127  }
  0x2a   : > { %1123 = vset.pattern.permute.xlu0 %v1225_v4  ;;  %1119 = vset.pattern.permute.xlu1 %v1223_v0  ;;  %s291_s13 = scalar_lea.vmem %s1739_s0, %s1050_s29  ;;  %s1232_s19 = smov 113  }
  0x2b   : > { %429 = vperm.xlu0 %1123, %v295_v2   ;;  %341 = vperm.xlu1 %1119, %v294_v3   ;;  %v1373_v21 = vld [vmem:[%s291_s13] sm:$0xff]  ;;  %s1233_s20 = smov 112   ;;  %s1234_s21 = smov 111  }
  0x2c   : > { %1754 = vst [vmem:[#allocation8_spill] sm:$0xff] %v1373_v21  ;;  %v315_v25 = vrot.slane %v1373_v21, %v314_v19  ;;  %v319_v26 = vrot.slane %v1373_v21, %v318_v20  ;;  %v351_v32 = vrot.slane %v1373_v21, %v350_v23  ;;  %v355_v33 = vrot.slane %v1373_v21, %v354_v24  ;;  %s1236_s29 = smov [#allocation5]  }
  0x2d   : > { %v393_v37 = vrot.slane %v1373_v21, %v392_v27  ;;  %v397_v38 = vrot.slane %v1373_v21, %v396_v28  ;;  %v435_v39 = vrot.slane %v1373_v21, %v434_v30  ;;  %v439_v40 = vrot.slane %v1373_v21, %v438_v31 }
  0x2e   : > { %v325_v35 = vrot.slane %v315_v25, %v314_v19  ;;  %v329_v36 = vrot.slane %v319_v26, %v314_v19  ;;  %v361_v42 = vrot.slane %v351_v32, %v350_v23  ;;  %v365_v43 = vrot.slane %v355_v33, %v350_v23 }
  0x2f   : > { %1120 = vset.pattern.permute.xlu1 %v1226_v6  ;;  %421 = vperm.xlu0 %1123, %v293_v5   ;;  %v403_v48 = vrot.slane %v393_v37, %v392_v27  ;;  %v407_v49 = vrot.slane %v397_v38, %v392_v27  ;;  %v445_v50 = vrot.slane %v435_v39, %v434_v30 }
  0x30   : > { %387 = vperm.xlu1 %1120, %v295_v2   ;;  %v449_v51 = vrot.slane %v439_v40, %v434_v30 }
  0x33   : > { %1125 = vset.pattern.permute.xlu0 %v1224_v1 }
  0x34   : > { %1121 = vset.pattern.permute.xlu1 %v1223_v0  ;;  %308 = vperm.xlu0 %1125, %v295_v2  }
  0x35   : > { %337 = vperm.xlu1 %1121, %v293_v5  }
  0x38   : > { %298 = vperm.xlu0 %1125, %v293_v5  }
  0x39   : > { %1122 = vset.pattern.permute.xlu1 %v1226_v6 }
  0x3a   : > { %383 = vperm.xlu1 %1122, %v294_v3  }
  0x3c   : > { %472 = vperm.xlu0 %1125, %v463_v7  }
  0x3e   : > { %379 = vperm.xlu1 %1122, %v293_v5  }
  0x40   : > { %832 = vperm.xlu0 %1125, %v823_v8  }
  0x42   : > { %1124 = vset.pattern.permute.xlu1 %v1225_v4 }
  0x43   : > { %425 = vperm.xlu1 %1124, %v294_v3  }
  0x47   : > { %1126 = vset.pattern.permute.xlu1 %v1224_v1 }
  0x48   : > { %477 = vperm.xlu1 %1126, %v464_v9  }
  0x4c   : > { %467 = vperm.xlu1 %1126, %v462_v10  }
  0x50   : > { %837 = vperm.xlu1 %1126, %v824_v11  }
  0xa1   : > { %v304_v12 = vpop.permute.xlu1 %303  ;;  %v346_v13 = vpop.permute.xlu0 %345 }
  0xa2   : > { %v370_v46 = vmul.f32 %v361_v42, %v346_v13  ;;  %v371_v47 = vmul.f32 %v365_v43, %v346_v13  ;;  %v332_v59 = vmul.f32 %v325_v35, %v304_v12  ;;  %v333_v60 = vmul.f32 %v329_v36, %v304_v12 }
  0xa6   : > { %v342_v15 = vpop.permute.xlu1 %341  ;;  %v430_v16 = vpop.permute.xlu0 %429 }
  0xa7   : > { %v368_v55 = vmul.f32 %v361_v42, %v342_v15  ;;  %v369_v56 = vmul.f32 %v365_v43, %v342_v15  ;;  %v454_v61 = vmul.f32 %v445_v50, %v430_v16  ;;  %v455_v62 = vmul.f32 %v449_v51, %v430_v16 }
  0xa9   : > { %v374_v4 = vadd.f32 %v368_v55, %v332_v59  ;;  %v375_v5 = vadd.f32 %v369_v56, %v333_v60  ;;  %v1464_v55 = vand.u32 127, %v312_v14 }
  0xaa   : > { %v1375_v22 = vpop.permute.xlu0 %421 }
  0xab   : > { %v388_v18 = vpop.permute.xlu1 %387  ;;  %vm512_vm0 = vcmp.lt.s32.totalorder %v1464_v55, 17  ;;  %vm549_vm1 = vcmp.lt.s32.totalorder %v1464_v55, 16  ;;  %vm587_vm2 = vcmp.lt.s32.totalorder %v1464_v55, 15  ;;  %vm625_vm3 = vcmp.lt.s32.totalorder %v1464_v55, 1 }
  0xac   : > { %v412_v57 = vmul.f32 %v403_v48, %v388_v18  ;;  %v413_v58 = vmul.f32 %v407_v49, %v388_v18  ;;  %vm682_vm4 = vcmp.lt.s32.totalorder %v1464_v55, 127  ;;  %vm720_vm5 = vcmp.lt.s32.totalorder %v1464_v55, 113 }
  0xad   : > { %vm758_vm6 = vcmp.lt.s32.totalorder %v1464_v55, 112  ;;  %vm796_vm7 = vcmp.lt.s32.totalorder %v1464_v55, 111 }
  0xaf   : > { %v309_v34 = vpop.permute.xlu0 %308 }
  0xb0   : > { %v1379_v29 = vpop.permute.xlu1 %337  ;;  %v334_v44 = vmul.f32 %v325_v35, %v309_v34  ;;  %v335_v45 = vmul.f32 %v329_v36, %v309_v34 }
  0xb1   : > { %v366_v31 = vmul.f32 %v361_v42, %v1379_v29  ;;  %v367_v32 = vmul.f32 %v365_v43, %v1379_v29  ;;  %v450_v29 = vmul.f32 %v445_v50, %v1375_v22 }
  0xb2   : > { %v376_v53 = vadd.f32 %v370_v46, %v334_v44  ;;  %v377_v54 = vadd.f32 %v371_v47, %v335_v45 }
  0xb3   : > { %v299_v8 = vpop.permute.xlu0 %298 }
  0xb4   : > { %v418_v2 = vadd.f32 %v412_v57, %v376_v53  ;;  %v419_v3 = vadd.f32 %v413_v58, %v377_v54  ;;  %v330_v23 = vmul.f32 %v325_v35, %v299_v8  ;;  %v331_v24 = vmul.f32 %v329_v36, %v299_v8  ;;  %v822_v53 = vld [vmem:[%s1743_s4] sm:$0xff] }
  0xb5   : > { %v384_v41 = vpop.permute.xlu1 %383  ;;  %v1235_v54 = vmov 0.0  }
  0xb6   : > { %v410_v63 = vmul.f32 %v403_v48, %v384_v41  ;;  %v411_v0 = vmul.f32 %v407_v49, %v384_v41  ;;  %v460_v11 = vadd.f32 %v454_v61, %v418_v2  ;;  %v461_v13 = vadd.f32 %v455_v62, %v419_v3  ;;  %933 = vmatprep.mubr.f32.mxu0 %v1235_v54 }
  0xb7   : > { %v473_v25 = vpop.permute.xlu0 %472  ;;  %v372_v35 = vadd.f32 %v366_v31, %v330_v23  ;;  %v373_v36 = vadd.f32 %v367_v32, %v331_v24  ;;  %v451_v41 = vmul.f32 %v449_v51, %v1375_v22 }
  0xb8   : > { %v416_v9 = vadd.f32 %v410_v63, %v374_v4  ;;  %v417_v10 = vadd.f32 %v411_v0, %v375_v5 }
  0xb9   : > { %v380_v52 = vpop.permute.xlu1 %379 }
  0xba   : > { %v408_v33 = vmul.f32 %v403_v48, %v380_v52  ;;  %v409_v34 = vmul.f32 %v407_v49, %v380_v52  ;;  %v859_v52 = vld [vmem:[%s1745_s6] sm:$0xf] }
  0xbb   : > { %v1466_v56 = vpop.permute.xlu0 %832 }
  0xbc   : > { %v414_v39 = vadd.f32 %v408_v33, %v372_v35  ;;  %v415_v40 = vadd.f32 %v409_v34, %v373_v36  ;;  %1756 = vst [vmem:[#allocation10_spill] sm:$0xff] %v1466_v56  ;;  %v654_v35 = vld [vmem:[#allocation2 + $0xd0] sm:$0xff]  ;;  %v655_v36 = vld [vmem:[#allocation2 + $0xd8] sm:$0xff] }
  0xbd   : > { %v637_v56 = vld [vmem:[#allocation2 + $0xb0] sm:$0xff] }
  0xbe   : > { %v426_v1 = vpop.permute.xlu1 %425  ;;  %v456_v45 = vadd.f32 %v450_v29, %v414_v39  ;;  %v457_v46 = vadd.f32 %v451_v41, %v415_v40  ;;  %v656_v29 = vld [vmem:[#allocation2 + $0xe0] sm:$0xff] }
  0xbf   : > { %v452_v6 = vmul.f32 %v445_v50, %v426_v1  ;;  %v453_v7 = vmul.f32 %v449_v51, %v426_v1  ;;  %v523_v41 = vld [vmem:[#allocation2 + $0x20] sm:$0xff] }
  0xc1   : > { %v458_v17 = vadd.f32 %v452_v6, %v416_v9  ;;  %v459_v18 = vadd.f32 %v453_v7, %v417_v10 }
  0xc3   : > { %v478_v15 = vpop.permute.xlu1 %477  ;;  %v482_v26 = vadd.f32 %v473_v25, %v458_v17  ;;  %v483_v27 = vadd.f32 %v473_v25, %v459_v18 }
  0xc4   : > { %v484_v12 = vadd.f32 %v478_v15, %v460_v11  ;;  %v485_v19 = vadd.f32 %v478_v15, %v461_v13 }
  0xc5   : > { %v488_v37 = vmax.f32 %v482_v26, 0.0  ;;  %v489_v38 = vmax.f32 %v483_v27, 0.0 }
  0xc6   : > { %v490_v16 = vmax.f32 %v484_v12, 0.0  ;;  %v491_v20 = vmax.f32 %v485_v19, 0.0 }
  0xc7   : > { %v1401_v42 = vmin.f32 %v488_v37, 6.0  ;;  %v1403_v43 = vmin.f32 %v489_v38, 6.0  ;;  %v468_v44 = vpop.permute.xlu1 %467  ;;  %v561_v37 = vld [vmem:[#allocation2 + $0x50] sm:$0xff]  ;;  %v562_v38 = vld [vmem:[#allocation2 + $0x58] sm:$0xff] }
  0xc8   : > { %v1387_v28 = vmin.f32 %v490_v16, 6.0  ;;  %v1389_v30 = vmin.f32 %v491_v20, 6.0  ;;  %v480_v47 = vadd.f32 %v468_v44, %v456_v45  ;;  %v481_v48 = vadd.f32 %v468_v44, %v457_v46  ;;  %v559_v44 = vld [vmem:[#allocation2 + $0x40] sm:$0xff]  ;;  %v560_v45 = vld [vmem:[#allocation2 + $0x48] sm:$0xff] }
  0xca   : > { %508 = vrot.lane.b32.xlu0 %v1389_v30, %s1227_s14  ;;  %502 = vrot.lane.b32.xlu1 %v1387_v28, %s1227_s14  ;;  %v486_v22 = vmax.f32 %v480_v47, 0.0  ;;  %v487_v49 = vmax.f32 %v481_v48, 0.0 }
  0xcb   : > { %v1468_v57 = vpop.permute.xlu1 %837 }
  0xcc   : > { %v1413_v50 = vmin.f32 %v486_v22, 6.0  ;;  %v1415_v51 = vmin.f32 %v487_v49, 6.0  ;;  %v524_v49 = vld [vmem:[#allocation2 + $0x28] sm:$0xff] }
  0xce   : > { %547 = vrot.lane.b32.xlu0 %v1389_v30, %s1228_s15  ;;  %541 = vrot.lane.b32.xlu1 %v1387_v28, %s1228_s15  ;;  %1755 = vst [vmem:[#allocation9_spill] sm:$0xff] %v1413_v50 }
  0xd2   : > { %506 = vrot.lane.b32.xlu0 %v1403_v43, %s1227_s14  ;;  %500 = vrot.lane.b32.xlu1 %v1401_v42, %s1227_s14 }
  0xd6   : > { %545 = vrot.lane.b32.xlu0 %v1403_v43, %s1228_s15  ;;  %539 = vrot.lane.b32.xlu1 %v1401_v42, %s1228_s15 }
  0xda   : > { %585 = vrot.lane.b32.xlu0 %v1389_v30, %s1229_s16  ;;  %579 = vrot.lane.b32.xlu1 %v1387_v28, %s1229_s16 }
  0xde   : > { %504 = vrot.lane.b32.xlu0 %v1415_v51, %s1227_s14  ;;  %498 = vrot.lane.b32.xlu1 %v1413_v50, %s1227_s14  ;;  %s284_s14 = sand.u32 1, %s1210_s25  }
  0xdf   : > { %s950_s22 = scalar_lea.sflag [#allocation4], %s284_s14 }
  0xe2   : > { %543 = vrot.lane.b32.xlu0 %v1415_v51, %s1228_s15  ;;  %537 = vrot.lane.b32.xlu1 %v1413_v50, %s1228_s15  ;;  %s1041_s15 = sshll.u32 %s284_s14, 3 }
  0xe6   : > { %583 = vrot.lane.b32.xlu0 %v1403_v43, %s1229_s16  ;;  %577 = vrot.lane.b32.xlu1 %v1401_v42, %s1229_s16 }
  0xea   : > { %623 = vrot.lane.b32.xlu0 %v1389_v30, %s1230_s17  ;;  %617 = vrot.lane.b32.xlu1 %v1387_v28, %s1230_s17 }
  0xee   : > { %581 = vrot.lane.b32.xlu0 %v1415_v51, %s1229_s16  ;;  %575 = vrot.lane.b32.xlu1 %v1413_v50, %s1229_s16  ;;  %s1051_s16 = sshll.u32 %s1298_s28, 7  ;;  %s1158_s28 = sshll.u32 %s1236_s29, 4  ;;  %s1159_s28 = int_to_ptr.vmem [resolvable:$false] %s1158_s28 }
  0xef   : > { %s1160_s8 = scalar_lea.vmem %s1159_s28, 256 }
  0xf2   : > { %621 = vrot.lane.b32.xlu0 %v1403_v43, %s1230_s17  ;;  %615 = vrot.lane.b32.xlu1 %v1401_v42, %s1230_s17 }
  0xf6   : > { %619 = vrot.lane.b32.xlu0 %v1415_v51, %s1230_s17  ;;  %613 = vrot.lane.b32.xlu1 %v1413_v50, %s1230_s17  ;;  %s286_s17 = scalar_lea.vmem [#allocation5], %s1041_s15 }
  0xfa   : > { %680 = vrot.lane.b32.xlu0 %v1389_v30, %s1231_s18  ;;  %674 = vrot.lane.b32.xlu1 %v1387_v28, %s1231_s18 }
  0xfe   : > { %678 = vrot.lane.b32.xlu0 %v1403_v43, %s1231_s18  ;;  %672 = vrot.lane.b32.xlu1 %v1401_v42, %s1231_s18 }
 0x102   : > { %718 = vrot.lane.b32.xlu0 %v1389_v30, %s1232_s19  ;;  %712 = vrot.lane.b32.xlu1 %v1387_v28, %s1232_s19 }
 0x106   : > { %676 = vrot.lane.b32.xlu0 %v1415_v51, %s1231_s18  ;;  %670 = vrot.lane.b32.xlu1 %v1413_v50, %s1231_s18  ;;  %s964_s18 = sshll.u32 %s286_s17, 4  ;;  %s965_s18 = int_to_ptr.vmem [resolvable:$true] %s964_s18 }
 0x107   : > { %s1154_s23 = scalar_lea.vmem %s965_s18, 128  ;;  %p1161_p11 = scmp.lt.s32.totalorder %s965_s18, %s1159_s28 }
 0x108   : > { %p1155_p8 = scmp.ne.s32.totalorder %s965_s18, %s1154_s23  ;;  %p1162_p12 = scmp.lt.s32.totalorder %s1160_s8, %s1154_s23 }
 0x10a   : > { %716 = vrot.lane.b32.xlu0 %v1403_v43, %s1232_s19  ;;  %710 = vrot.lane.b32.xlu1 %v1401_v42, %s1232_s19  ;;  %p1156_p9 = pnand %p1155_p8, %p1315_p5  ;;  %p1163_p13 = por %p1162_p12, %p1161_p11 }
 0x10c   : > { %p1157_p10 = pneg %p1156_p9 }
 0x10e   : > { %756 = vrot.lane.b32.xlu0 %v1389_v30, %s1233_s20  ;;  %750 = vrot.lane.b32.xlu1 %v1387_v28, %s1233_s20  ;;  %p1164_p0 = pnand %p1163_p13, %p1157_p10 }
 0x112   : > { %714 = vrot.lane.b32.xlu0 %v1415_v51, %s1232_s19  ;;  %708 = vrot.lane.b32.xlu1 %v1413_v50, %s1232_s19 }
 0x116   : > { %754 = vrot.lane.b32.xlu0 %v1403_v43, %s1233_s20  ;;  %748 = vrot.lane.b32.xlu1 %v1401_v42, %s1233_s20 }
 0x11a   : > { %794 = vrot.lane.b32.xlu0 %v1389_v30, %s1234_s21  ;;  %788 = vrot.lane.b32.xlu1 %v1387_v28, %s1234_s21 }
 0x11e   : > { %746 = vrot.lane.b32.xlu0 %v1413_v50, %s1233_s20  ;;  %752 = vrot.lane.b32.xlu1 %v1415_v51, %s1233_s20 }
 0x122   : > { %786 = vrot.lane.b32.xlu0 %v1401_v42, %s1234_s21  ;;  %792 = vrot.lane.b32.xlu1 %v1403_v43, %s1234_s21 }
 0x126   : > { %790 = vrot.lane.b32.xlu0 %v1415_v51, %s1234_s21  ;;  %784 = vrot.lane.b32.xlu1 %v1413_v50, %s1234_s21  ;;  %v638_v50 = vld [vmem:[#allocation2 + $0xb8] sm:$0xff]  ;;  %s962_s21 = scalar_lea.hbm %s1746_s7, %s1051_s16 }
 0x12a   : > { %862 = vperm.xlu0 %1125, %v859_v52   ;;  %827 = vperm.xlu1 %1126, %v822_v53   ;;  %v599_v52 = vld [vmem:[#allocation2 + $0x80] sm:$0xff]  ;;  %v600_v53 = vld [vmem:[#allocation2 + $0x88] sm:$0xff] }
 0x13c   : > { %v509_v58 = vpop.permute.xlu0 %508  ;;  %v503_v59 = vpop.permute.xlu1 %502 }
 0x13d   : > { %v1473_v60 = vsel %vm512_vm0, %v503_v59, %v509_v58  ;;  %v1477_v61 = vsel %vm512_vm0, %v509_v58, %v503_v59  ;;  %v1547_v59 = vmul.f32 %v654_v35, %v1401_v42 }
 0x13e   : > { %v530_v35 = vmul.f32 %v524_v49, %v1473_v60 }
 0x140   : > { %v548_v62 = vpop.permute.xlu0 %547  ;;  %v542_v63 = vpop.permute.xlu1 %541 }
 0x141   : > { %v552_v39 = vsel %vm549_vm1, %v542_v63, %v548_v62  ;;  %v555_v40 = vsel %vm549_vm1, %v548_v62, %v542_v63 }
 0x142   : > { %v567_v62 = vmul.f32 %v561_v37, %v555_v40  ;;  %v568_v63 = vmul.f32 %v562_v38, %v552_v39 }
 0x144   : > { %v507_v14 = vpop.permute.xlu0 %506  ;;  %v501_v0 = vpop.permute.xlu1 %500 }
 0x145   : > { %v1481_v1 = vsel %vm512_vm0, %v501_v0, %v507_v14  ;;  %v1485_v2 = vsel %vm512_vm0, %v507_v14, %v501_v0  ;;  %v521_v14 = vld [vmem:[#allocation2 + $0x10] sm:$0xff]  ;;  %v522_v0 = vld [vmem:[#allocation2 + $0x18] sm:$0xff] }
 0x146   : > { %v528_v39 = vmul.f32 %v522_v0, %v1481_v1  ;;  %v598_v1 = vld [vmem:[#allocation2 + $0x78] sm:$0xff] }
 0x148   : > { %v546_v3 = vpop.permute.xlu0 %545  ;;  %v540_v4 = vpop.permute.xlu1 %539 }
 0x149   : > { %v551_v46 = vsel %vm549_vm1, %v540_v4, %v546_v3  ;;  %v554_v47 = vsel %vm549_vm1, %v546_v3, %v540_v4  ;;  %v657_v3 = vld [vmem:[#allocation2 + $0xe8] sm:$0xff]  ;;  %v1550_v4 = vmul.f32 %v656_v29, %v1387_v28 }
 0x14a   : > { %v566_v21 = vmul.f32 %v560_v45, %v551_v46  ;;  %v663_v40 = vmul.f32 %v657_v3, %v1389_v30 }
 0x14c   : > { %v586_v5 = vpop.permute.xlu0 %585  ;;  %v580_v6 = vpop.permute.xlu1 %579  ;;  %v572_v45 = vadd.f32 %v566_v21, %v528_v39 }
 0x14d   : > { %v590_v54 = vsel %vm587_vm2, %v580_v6, %v586_v5  ;;  %v593_v58 = vsel %vm587_vm2, %v586_v5, %v580_v6  ;;  %v529_v6 = vmul.f32 %v523_v41, %v1477_v61  ;;  %v520_v61 = vld [vmem:[#allocation2 + $0x8] sm:$0xff] }
 0x14e   : > { %v605_v37 = vmul.f32 %v599_v52, %v593_v58  ;;  %v606_v28 = vmul.f32 %v600_v53, %v590_v54  ;;  %v694_v53 = vld [vmem:[#allocation2 + $0x110] sm:$0xff]  ;;  %v695_v54 = vld [vmem:[#allocation2 + $0x118] sm:$0xff] }
 0x14f   : > { %v573_v29 = vadd.f32 %v567_v62, %v529_v6  ;;  %v733_v6 = vld [vmem:[#allocation2 + $0x148] sm:$0xff] }
 0x150   : > { %v505_v7 = vpop.permute.xlu0 %504  ;;  %v499_v8 = vpop.permute.xlu1 %498 }
 0x151   : > { %v1489_v9 = vsel %vm512_vm0, %v499_v8, %v505_v7  ;;  %v1493_v10 = vsel %vm512_vm0, %v505_v7, %v499_v8  ;;  %v1553_v7 = vmul.f32 %v655_v36, %v1403_v43  ;;  %v565_v8 = vmul.f32 %v559_v44, %v554_v47  ;;  %v597_v47 = vld [vmem:[#allocation2 + $0x70] sm:$0xff] }
 0x152   : > { %v527_v36 = vmul.f32 %v521_v14, %v1485_v2  ;;  %v611_v46 = vadd.f32 %v605_v37, %v573_v29  ;;  %v526_v52 = vmul.f32 %v520_v61, %v1489_v9 }
 0x154   : > { %v1495_v11 = vpop.permute.xlu0 %543  ;;  %v1497_v13 = vpop.permute.xlu1 %537  ;;  %v571_v44 = vadd.f32 %v565_v8, %v527_v36  ;;  %v635_v8 = vld [vmem:[#allocation2 + $0xa0] sm:$0xff] }
 0x155   : > { %v553_v9 = vsel %vm549_vm1, %v1495_v11, %v1497_v13 }
 0x158   : > { %v1499_v15 = vpop.permute.xlu0 %583  ;;  %v1501_v17 = vpop.permute.xlu1 %577 }
 0x159   : > { %v589_v30 = vsel %vm587_vm2, %v1501_v17, %v1499_v15 }
 0x15a   : > { %v604_v3 = vmul.f32 %v598_v1, %v589_v30 }
 0x15c   : > { %v624_v18 = vpop.permute.xlu0 %623  ;;  %v618_v12 = vpop.permute.xlu1 %617 }
 0x15d   : > { %v628_v5 = vsel %vm625_vm3, %v618_v12, %v624_v18  ;;  %v631_v42 = vsel %vm625_vm3, %v624_v18, %v618_v12  ;;  %v574_v18 = vadd.f32 %v568_v63, %v530_v35  ;;  %v519_v12 = vld [vmem:[#allocation2] sm:$0xff]  ;;  %v557_v63 = vld [vmem:[#allocation2 + $0x30] sm:$0xff] }
 0x15e   : > { %v643_v41 = vmul.f32 %v637_v56, %v631_v42  ;;  %v644_v60 = vmul.f32 %v638_v50, %v628_v5  ;;  %v592_v50 = vsel %vm587_vm2, %v1499_v15, %v1501_v17  ;;  %v525_v49 = vmul.f32 %v519_v12, %v1493_v10  ;;  %v558_v15 = vld [vmem:[#allocation2 + $0x38] sm:$0xff]  ;;  %v636_v5 = vld [vmem:[#allocation2 + $0xa8] sm:$0xff] }
 0x15f   : > { %v612_v2 = vadd.f32 %v606_v28, %v574_v18  ;;  %v550_v10 = vsel %vm549_vm1, %v1497_v13, %v1495_v11  ;;  %v603_v0 = vmul.f32 %v597_v47, %v592_v50  ;;  %v732_v13 = vld [vmem:[#allocation2 + $0x140] sm:$0xff] }
 0x160   : > { %v1503_v19 = vpop.permute.xlu0 %581  ;;  %v1505_v16 = vpop.permute.xlu1 %575  ;;  %v649_v17 = vadd.f32 %v643_v41, %v611_v46  ;;  %v596_v46 = vld [vmem:[#allocation2 + $0x68] sm:$0xff] }
 0x161   : > { %v650_v14 = vadd.f32 %v644_v60, %v612_v2  ;;  %v588_v39 = vsel %vm587_vm2, %v1505_v16, %v1503_v19  ;;  %v591_v29 = vsel %vm587_vm2, %v1503_v19, %v1505_v16  ;;  %v595_v60 = vld [vmem:[#allocation2 + $0x60] sm:$0xff]  ;;  %v609_v50 = vadd.f32 %v603_v0, %v571_v44 }
 0x162   : > { %v668_v18 = vadd.f32 %v1550_v4, %v649_v17 }
 0x163   : > { %v669_v12 = vadd.f32 %v663_v40, %v650_v14 }
 0x164   : > { %v1507_v20 = vpop.permute.xlu0 %621  ;;  %v1509_v23 = vpop.permute.xlu1 %615 }
 0x168   : > { %v1511_v24 = vpop.permute.xlu0 %619  ;;  %v1513_v25 = vpop.permute.xlu1 %613 }
 0x16c   : > { %v1515_v26 = vpop.permute.xlu0 %680  ;;  %v1517_v27 = vpop.permute.xlu1 %674 }
 0x16d   : > { %v685_v58 = vsel %vm682_vm4, %v1517_v27, %v1515_v26  ;;  %v688_v62 = vsel %vm682_vm4, %v1515_v26, %v1517_v27  ;;  %v627_v26 = vsel %vm625_vm3, %v1509_v23, %v1507_v20  ;;  %v630_v27 = vsel %vm625_vm3, %v1507_v20, %v1509_v23 }
 0x16e   : > { %v700_v42 = vmul.f32 %v694_v53, %v685_v58  ;;  %v701_v11 = vmul.f32 %v695_v54, %v688_v62  ;;  %v563_v20 = vmul.f32 %v557_v63, %v553_v9  ;;  %v564_v23 = vmul.f32 %v558_v15, %v550_v10  ;;  %v692_v54 = vld [vmem:[#allocation2 + $0x100] sm:$0xff]  ;;  %v693_v58 = vld [vmem:[#allocation2 + $0x108] sm:$0xff] }
 0x16f   : > { %v641_v2 = vmul.f32 %v635_v8, %v630_v27  ;;  %v642_v47 = vmul.f32 %v636_v5, %v627_v26  ;;  %v610_v53 = vadd.f32 %v604_v3, %v572_v45  ;;  %v601_v15 = vmul.f32 %v595_v60, %v591_v29  ;;  %v808_v3 = vld [vmem:[#allocation2 + $0x1a0] sm:$0xff]  ;;  %v809_v8 = vld [vmem:[#allocation2 + $0x1a8] sm:$0xff]  ;;  %v730_v5 = vld [vmem:[#allocation2 + $0x130] sm:$0xff] }
 0x170   : > { %v1519_v31 = vpop.permute.xlu0 %678  ;;  %v1521_v32 = vpop.permute.xlu1 %672  ;;  %v706_v19 = vadd.f32 %v700_v42, %v668_v18  ;;  %v707_v16 = vadd.f32 %v701_v11, %v669_v12  ;;  %v569_v44 = vadd.f32 %v563_v20, %v525_v49  ;;  %v570_v45 = vadd.f32 %v564_v23, %v526_v52  ;;  %v731_v42 = vld [vmem:[#allocation2 + $0x138] sm:$0xff]  ;;  %v769_v20 = vld [vmem:[#allocation2 + $0x168] sm:$0xff] }
 0x171   : > { %v684_v62 = vsel %vm682_vm4, %v1521_v32, %v1519_v31  ;;  %v602_v10 = vmul.f32 %v596_v46, %v588_v39  ;;  %v647_v9 = vadd.f32 %v641_v2, %v609_v50  ;;  %v648_v17 = vadd.f32 %v642_v47, %v610_v53 }
 0x172   : > { %v698_v26 = vmul.f32 %v692_v54, %v684_v62  ;;  %v629_v60 = vsel %vm625_vm3, %v1511_v24, %v1513_v25  ;;  %v607_v53 = vadd.f32 %v601_v15, %v569_v44  ;;  %v652_v15 = vld [vmem:[#allocation2 + $0xc0] sm:$0xff] }
 0x173   : > { %v667_v18 = vadd.f32 %v1553_v7, %v648_v17 }
 0x174   : > { %v1524_v33 = vpop.permute.xlu0 %718  ;;  %v1526_v34 = vpop.permute.xlu1 %712 }
 0x175   : > { %v723_v35 = vsel %vm720_vm5, %v1526_v34, %v1524_v33  ;;  %v726_v37 = vsel %vm720_vm5, %v1524_v33, %v1526_v34  ;;  %v770_v33 = vld [vmem:[#allocation2 + $0x170] sm:$0xff]  ;;  %v771_v34 = vld [vmem:[#allocation2 + $0x178] sm:$0xff] }
 0x176   : > { %v738_v1 = vmul.f32 %v732_v13, %v723_v35  ;;  %v739_v30 = vmul.f32 %v733_v6, %v726_v37  ;;  %v768_v37 = vld [vmem:[#allocation2 + $0x160] sm:$0xff] }
 0x178   : > { %v1538_v48 = vpop.permute.xlu0 %676  ;;  %v1540_v22 = vpop.permute.xlu1 %670  ;;  %v744_v14 = vadd.f32 %v738_v1, %v706_v19  ;;  %v745_v0 = vadd.f32 %v739_v30, %v707_v16  ;;  %v608_v19 = vadd.f32 %v602_v10, %v570_v45  ;;  %v653_v10 = vld [vmem:[#allocation2 + $0xc8] sm:$0xff] }
 0x17c   : > { %v1561_v38 = vpop.permute.xlu0 %716  ;;  %v1563_v43 = vpop.permute.xlu1 %710 }
 0x180   : > { %v757_v56 = vpop.permute.xlu0 %756  ;;  %v751_v21 = vpop.permute.xlu1 %750 }
 0x181   : > { %v761_v61 = vsel %vm758_vm6, %v751_v21, %v757_v56  ;;  %v764_v41 = vsel %vm758_vm6, %v757_v56, %v751_v21  ;;  %v687_v56 = vsel %vm682_vm4, %v1519_v31, %v1521_v32  ;;  %v722_v31 = vsel %vm720_vm5, %v1563_v43, %v1561_v38 }
 0x182   : > { %v776_v21 = vmul.f32 %v770_v33, %v761_v61  ;;  %v777_v63 = vmul.f32 %v771_v34, %v764_v41  ;;  %v699_v27 = vmul.f32 %v693_v58, %v687_v56  ;;  %v725_v32 = vsel %vm720_vm5, %v1561_v38, %v1563_v43  ;;  %v633_v34 = vld [vmem:[#allocation2 + $0x90] sm:$0xff]  ;;  %v634_v61 = vld [vmem:[#allocation2 + $0x98] sm:$0xff] }
 0x183   : > { %v666_v43 = vadd.f32 %v1547_v59, %v647_v9  ;;  %v736_v12 = vmul.f32 %v730_v5, %v722_v31  ;;  %v737_v33 = vmul.f32 %v731_v42, %v725_v32  ;;  %v626_v41 = vsel %vm625_vm3, %v1513_v25, %v1511_v24  ;;  %v806_v56 = vld [vmem:[#allocation2 + $0x190] sm:$0xff]  ;;  %v807_v24 = vld [vmem:[#allocation2 + $0x198] sm:$0xff]  ;;  %v1757_v32 = vld [vmem:[#allocation9_spill] sm:$0xff] }
 0x184   : > { %v1614_v28 = vpop.permute.xlu0 %714  ;;  %v1616_v36 = vpop.permute.xlu1 %708  ;;  %v782_v11 = vadd.f32 %v776_v21, %v744_v14  ;;  %v783_v13 = vadd.f32 %v777_v63, %v745_v0  ;;  %v705_v7 = vadd.f32 %v699_v27, %v667_v18  ;;  %v640_v54 = vmul.f32 %v634_v61, %v626_v41 }
 0x185   : > { %v704_v1 = vadd.f32 %v698_v26, %v666_v43  ;;  %v683_v25 = vsel %vm682_vm4, %v1540_v22, %v1538_v48  ;;  %v686_v21 = vsel %vm682_vm4, %v1538_v48, %v1540_v22  ;;  %v659_v31 = vmul.f32 %v653_v10, %v1415_v51  ;;  %v858_v10 = vld [vmem:[%s1744_s5] sm:$0xf] }
 0x186   : > { %v743_v62 = vadd.f32 %v737_v33, %v705_v7  ;;  %v646_v42 = vadd.f32 %v640_v54, %v608_v19  ;;  %v766_v33 = vld [vmem:[#allocation2 + $0x150] sm:$0xff]  ;;  %v804_v7 = vld [vmem:[#allocation2 + $0x180] sm:$0xff] }
 0x187   : > { %v742_v58 = vadd.f32 %v736_v12, %v704_v1 }
 0x188   : > { %v755_v4 = vpop.permute.xlu0 %754  ;;  %v749_v40 = vpop.permute.xlu1 %748  ;;  %v665_v18 = vadd.f32 %v659_v31, %v646_v42 }
 0x189   : > { %v760_v23 = vsel %vm758_vm6, %v749_v40, %v755_v4  ;;  %v763_v39 = vsel %vm758_vm6, %v755_v4, %v749_v40  ;;  %v639_v40 = vmul.f32 %v633_v34, %v629_v60  ;;  %v767_v34 = vld [vmem:[#allocation2 + $0x158] sm:$0xff] }
 0x18a   : > { %v774_v30 = vmul.f32 %v768_v37, %v760_v23  ;;  %v775_v50 = vmul.f32 %v769_v20, %v763_v39  ;;  %v729_v37 = vld [vmem:[#allocation2 + $0x128] sm:$0xff]  ;;  %v721_v20 = vsel %vm720_vm5, %v1616_v36, %v1614_v28  ;;  %v724_v23 = vsel %vm720_vm5, %v1614_v28, %v1616_v36 }
 0x18b   : > { %v645_v22 = vadd.f32 %v639_v40, %v607_v53 }
 0x18c   : > { %v795_v49 = vpop.permute.xlu0 %794  ;;  %v789_v52 = vpop.permute.xlu1 %788  ;;  %v780_v9 = vadd.f32 %v774_v30, %v742_v58  ;;  %v781_v17 = vadd.f32 %v775_v50, %v743_v62  ;;  %v805_v30 = vld [vmem:[#allocation2 + $0x188] sm:$0xff] }
 0x18d   : > { %v799_v6 = vsel %vm796_vm7, %v789_v52, %v795_v49  ;;  %v802_v35 = vsel %vm796_vm7, %v795_v49, %v789_v52  ;;  %v658_v49 = vmul.f32 %v652_v15, %v1757_v32 }
 0x18e   : > { %v814_v29 = vmul.f32 %v808_v3, %v799_v6  ;;  %v815_v38 = vmul.f32 %v809_v8, %v802_v35  ;;  %v690_v3 = vld [vmem:[#allocation2 + $0xf0] sm:$0xff]  ;;  %v691_v8 = vld [vmem:[#allocation2 + $0xf8] sm:$0xff]  ;;  %v728_v35 = vld [vmem:[#allocation2 + $0x120] sm:$0xff] }
 0x18f   : > { %v697_v6 = vmul.f32 %v691_v8, %v686_v21  ;;  %v664_v12 = vadd.f32 %v658_v49, %v645_v22  ;;  %v734_v60 = vmul.f32 %v728_v35, %v721_v20 }
 0x190   : > { %v747_v46 = vpop.permute.xlu0 %746  ;;  %v753_v2 = vpop.permute.xlu1 %752  ;;  %v821_v47 = vadd.f32 %v815_v38, %v783_v13  ;;  %v820_v59 = vadd.f32 %v814_v29, %v782_v11  ;;  %v696_v13 = vmul.f32 %v690_v3, %v683_v25  ;;  %v1758_v29 = vld [vmem:[#allocation10_spill] sm:$0xff] }
 0x191   : > { %v759_v61 = vsel %vm758_vm6, %v747_v46, %v753_v2  ;;  %v762_v41 = vsel %vm758_vm6, %v753_v2, %v747_v46  ;;  %v703_v1 = vadd.f32 %v697_v6, %v665_v18 }
 0x192   : > { %v845_v16 = vadd.f32 %v1468_v57, %v821_v47  ;;  %v844_v4 = vadd.f32 %v1468_v57, %v820_v59  ;;  %v735_v47 = vmul.f32 %v729_v37, %v724_v23  ;;  %v702_v59 = vadd.f32 %v696_v13, %v664_v12 }
 0x193   : > { %v772_v19 = vmul.f32 %v766_v33, %v759_v61 }
 0x194   : > { %v787_v63 = vpop.permute.xlu0 %786  ;;  %v793_v44 = vpop.permute.xlu1 %792  ;;  %v851_v45 = vmax.f32 %v845_v16, 0.0  ;;  %v850_v57 = vmax.f32 %v844_v4, 0.0  ;;  %v773_v16 = vmul.f32 %v767_v34, %v762_v41  ;;  %v740_v54 = vadd.f32 %v734_v60, %v702_v59 }
 0x195   : > { %v798_v14 = vsel %vm796_vm7, %v787_v63, %v793_v44  ;;  %v801_v0 = vsel %vm796_vm7, %v793_v44, %v787_v63  ;;  %v741_v46 = vadd.f32 %v735_v47, %v703_v1 }
 0x196   : > { %v812_v26 = vmul.f32 %v806_v56, %v798_v14  ;;  %v813_v27 = vmul.f32 %v807_v24, %v801_v0  ;;  %v857_v5 = vmin.f32 %v851_v45, 6.0  ;;  %v856_v48 = vmin.f32 %v850_v57, 6.0  ;;  %v1759_v0 = vld [vmem:[#allocation8_spill] sm:$0xff] }
 0x197   : > { %v779_v62 = vadd.f32 %v773_v16, %v741_v46  ;;  %v778_v56 = vadd.f32 %v772_v19, %v740_v54  ;;  %v940_v3 = vcombine.high %v1759_v0, %v1759_v0 }
 0x198   : > { %v818_v52 = vadd.f32 %v812_v26, %v780_v9  ;;  %v819_v11 = vadd.f32 %v813_v27, %v781_v17  ;;  %895 = vmatprep.subr.mxu0 %v857_v5  ;;  %v791_v51 = vpop.permute.xlu0 %790  ;;  %v785_v39 = vpop.permute.xlu1 %784 }
 0x199   : > { %896 = vmatpush1.msra.mxu0 %v856_v48  ;;  %v797_v50 = vsel %vm796_vm7, %v785_v39, %v791_v51  ;;  %v800_v53 = vsel %vm796_vm7, %v791_v51, %v785_v39 }
 0x19a   : > { %v843_v38 = vadd.f32 %v1758_v29, %v819_v11  ;;  %v842_v43 = vadd.f32 %v1758_v29, %v818_v52  ;;  %v810_v2 = vmul.f32 %v804_v7, %v797_v50  ;;  %v811_v58 = vmul.f32 %v805_v30, %v800_v53 }
 0x19c   : > { %v849_v28 = vmax.f32 %v843_v38, 0.0  ;;  %v848_v36 = vmax.f32 %v842_v43, 0.0  ;;  %v817_v24 = vadd.f32 %v811_v58, %v779_v62  ;;  %v816_v25 = vadd.f32 %v810_v2, %v778_v56 }
 0x19e   : > { %v855_v4 = vmin.f32 %v849_v28, 6.0  ;;  %v854_v40 = vmin.f32 %v848_v36, 6.0 }
 0x1a0   : > { %897 = vmatprep.subr.mxu0 %v855_v4 }
 0x1a1   : > { %898 = vmatpush1.msra.mxu0 %v854_v40 }
 0x1a5   : > { %v828_v21 = vpop.permute.xlu1 %827  ;;  %v863_v9 = vpop.permute.xlu0 %862 }
 0x1a6   : > { %v840_v63 = vadd.f32 %v828_v21, %v816_v25  ;;  %v841_v44 = vadd.f32 %v828_v21, %v817_v24 }
 0x1a8   : > { %v846_v55 = vmax.f32 %v840_v63, 0.0  ;;  %v847_v45 = vmax.f32 %v841_v44, 0.0 }
 0x1aa   : > { %v852_v57 = vmin.f32 %v846_v55, 6.0  ;;  %v853_v15 = vmin.f32 %v847_v45, 6.0 }
 0x1ac   : > { %899 = vmatprep.subr.mxu0 %v853_v15 }
 0x1ad   : > { %900 = vmatpush1.msra.mxu0 %v852_v57 }
 0x1ae   : > { %1044 = vmatmul.mubr.msk.f32.vlgmr.msra.gmra.mxu0 %vm865_vm8, %v858_v10 }
 0x26e   : > { %v935_v17 = vpop.f32.mrf.mxu0 }
 0x26f   : > { %v936_v14 = vadd.f32 %v935_v17, %v863_v9 }
 0x270   : > { %v937_v8 = vpop.f32.mrf.mxu0 }
 0x271   : > { %v938_v26 = vadd.f32 %v937_v8, %v863_v9  ;;  %v942_v27 = vadd.f32 %v936_v14, %v1759_v0 }
 0x273   : > { %v943_v5 = vadd.f32 %v940_v3, %v938_v26 }
 0x275   : > { %v946_v48 = vcombine.low %v942_v27, %v943_v5 }
 0x277   : > { %948 = vst [vmem:[%s286_s17] sm:$0xff] %v946_v48 }
 0x278   : > { %1167 = shalt.err (!%p1164_p0)
}
 0x279   : > { %s1168_s9 = scalar_lea.hbm %s962_s21, 128  ;;  %s1172_s15 = scalar_lea.hbm %s1746_s7, 256 }
 0x27a   : > { %p1169_p1 = scmp.ne.s32.totalorder %s962_s21, %s1168_s9  ;;  %p1173_p4 = scmp.lt.s32.totalorder %s962_s21, %s1746_s7 }
 0x27b   : > { %p1174_p7 = scmp.lt.s32.totalorder %s1172_s15, %s1168_s9 }
 0x27c   : > { %p1170_p2 = pnand %p1169_p1, %p1315_p5 }
 0x27d   : > { %p1175_p6 = por %p1174_p7, %p1173_p4 }
 0x27e   : > { %p1171_p3 = pneg %p1170_p2 }
 0x280   : > { %p1176_p8 = pnand %p1175_p6, %p1171_p3 }
 0x282   : > { %1179 = shalt.err (!%p1176_p8)
}
 0x283   : > { %1056 = dma.vmem_to_hbm [thread:$0]  (%p1315_p5), %s965_s18, 128, %s962_s21, %s950_s22  }
 0x284 PF: > { %p1068_p9 = scmp.ge.s32.totalorder %s1218_s27, 2  ;;  %s976_s19 = sand.u32 1, %s1206_s24  }
 0x285   : > { %p1760_p10 = scmp.ne.s32.totalorder %s1752_s12, 0  ;;  %s977_s20 = scalar_lea.sflag [#allocation4], %s976_s19 }
 0x287   : > { %p1063_p11 = pnand %p1068_p9, %p1760_p10 }
 0x289   : > { %p1064_p12 = pneg %p1063_p11 }
 0x28b   : > { %1201 = dma.done.wait (%p1064_p12), %s977_s20, 128  }
 0x28c   : > { %1203 = vsyncadd (%p1064_p12), %s977_s20, 4294967168  ;;  %p18_p13 = scmp.ge.s32.totalorder %s1302_s30, 4   ;;  %s1761_s24 = smov %s1210_s25 }
 0x28d   : > { %s1762_s25 = smov %s1214_s26  ;;  %s1763_s26 = smov %s1313_s10 }
 0x28e   : > { %s1764_s27 = smov %s1302_s30  ;;  %20 = sbr.rel (!%p18_p13) target bundleno = 4 (0x4), region = 96 }
 0x293   :  { %982 = vsyncpa [#allocation3], 1 }
 0x294   :  { %984 = vsyncpa [#allocation3 + $0x1], 1 }
 0x295   :  { %985 = vsyncpa [#allocation4], 1 }
 0x296   :  { %987 = vsyncpa [#allocation4 + $0x1], 1 }

</bundles_post_ra>
